<compile_context>
chip_gen: v7x
topology: tpu7x:2x2x1
jax: 0.10.0
libtpu: 0.0.40
codegen_flags: <defaults>
</compile_context>

<pallas_src>
import math
import jax
import jax.numpy as jnp
from jax.experimental import pallas as pl
from jax.experimental.pallas import tpu as pltpu

_LN_EPS = 1e-5


def _round_up(a, b):
    return (a + b - 1) // b * b


def _cdiv(a, b):
    return (a + b - 1) // b


def _vmem_cap_bytes():
    """Usable VMEM budget for this kernel, leaving headroom for Mosaic scratch."""
    try:
        phys = int(pltpu.get_tpu_info().vmem_capacity_bytes)
    except Exception:
        phys = 64 << 20  # conservative (v7x-sized) fallback
    return max(int(phys * 0.8), 16 << 20)


def _layer_norm_f32(xv, g, b, true_dim, need_mask):
    """f32 LayerNorm over the last (lane-padded) axis; padded lanes masked out."""
    inv_dim = 1.0 / true_dim
    mean = jnp.sum(xv, axis=-1, keepdims=True) * inv_dim
    cen = xv - mean
    if need_mask:
        lane = jax.lax.broadcasted_iota(jnp.int32, cen.shape, 1)
        cen = jnp.where(lane < true_dim, cen, 0.0)
    var = jnp.sum(cen * cen, axis=-1, keepdims=True) * inv_dim
    return (cen * jax.lax.rsqrt(var + _LN_EPS)) * g + b


def feed_forward(x, gamma, beta, w1, b1, w2, b2, *, tm=None, th=None):
    """x: (batch, seq, dim) -> (batch, seq, out_dim).

    Matches nn.Sequential(LayerNorm(dim), Linear(dim, hidden), GELU(),
    Linear(hidden, out)).  GELU uses the tanh approximation (EUP) per the
    performance review; the difference vs the exact-erf variant is well below
    bf16 matmul noise.
    """
    B, S, dim = x.shape
    hidden = w1.shape[1]
    out_dim = w2.shape[1]
    out_dtype = x.dtype
    out_isz = jnp.dtype(out_dtype).itemsize

    # ---- lane-dense geometry (every feature dim padded to x128) -----------
    M = B * S
    dim_pad = _round_up(dim, 128)
    hid_pad128 = _round_up(hidden, 128)
    out_pad = _round_up(out_dim, 128)
    need_mask = dim_pad != dim

    vmem_cap = _vmem_cap_bytes()
    small_bytes = 4 * (2 * dim_pad + hid_pad128 + out_pad) * 4  # gamma/beta/b1/b2 (+slack)

    # bf16 weight footprint; count twice in case the pipeline keeps two buffers.
    w_bytes = 2 * (dim_pad * hid_pad128 + hid_pad128 * out_pad)
    resident = (2 * w_bytes) <= (vmem_cap // 2)

    # ---- token-tile ceiling (sublane-friendly + megacore-friendly) --------
    tm_ceiling = _round_up(M, 16)
    if M >= 32:
        # v7x megacore: ensure >=2 token tiles so both TensorCores get work.
        tm_ceiling = min(tm_ceiling, _round_up(_cdiv(M, 2), 16))

    def footprint_resident(tm_):
        return (2 * tm_ * dim_pad * 2            # x tiles (bf16, double-buffered)
                + tm_ * dim_pad * 4              # f32 LayerNorm temporaries
                + 2 * w_bytes                    # resident bf16 W1 + W2
                + tm_ * hid_pad128 * 6           # hidden act: f32 + bf16 copy
                + 2 * tm_ * out_pad * out_isz    # output tiles (double-buffered)
                + small_bytes)

    def footprint_streaming(tm_, th_):
        return (2 * tm_ * dim_pad * 2            # x tiles (bf16, double-buffered)
                + tm_ * dim_pad * 2              # xln scratch (bf16)
                + tm_ * dim_pad * 4              # f32 LayerNorm temporaries
                + tm_ * out_pad * 4              # f32 output accumulator
                + 2 * dim_pad * th_ * 2          # W1 chunk (bf16, double-buffered)
                + 2 * th_ * out_pad * 2          # W2 chunk (bf16, double-buffered)
                + tm_ * th_ * 6                  # hidden chunk: f32 + bf16 copy
                + 2 * tm_ * out_pad * out_isz    # output tiles (double-buffered)
                + small_bytes)

    def pick_tm(fits_fn):
        for c in (1024, 512, 256, 128, 64, 32, 16):
            c = min(c, tm_ceiling)
            if fits_fn(c) <= vmem_cap:
                return c
        return min(16, tm_ceiling)

    if resident:
        hid_pad = hid_pad128
        th_eff = hid_pad
        tm_eff = pick_tm(footprint_resident) if tm is None \
            else min(_round_up(max(tm, 16), 16), tm_ceiling)
        footprint = footprint_resident(tm_eff)
    else:
        th_eff = _round_up(min(th if th is not None else 512, hid_pad128), 128)
        hid_pad = _round_up(hidden, th_eff)
        tm_eff = pick_tm(lambda t: footprint_streaming(t, th_eff)) if tm is None \
            else min(_round_up(max(tm, 16), 16), tm_ceiling)
        footprint = footprint_streaming(tm_eff, th_eff)

    if footprint > vmem_cap:
        raise ValueError(
            f"FeedForward tile footprint {footprint / 2**20:.1f} MiB exceeds the "
            f"VMEM budget {vmem_cap / 2**20:.1f} MiB; reduce tm/th.")

    M_pad = _round_up(M, tm_eff)
    n_tok = M_pad // tm_eff
    n_hid = hid_pad // th_eff

    # ---- wrapper-side padding / casting ------------------------------------
    # x cast to bf16 (halves HBM read traffic + VMEM tile size); zeros are
    # neutral everywhere by construction (padded lanes masked out of the LN
    # statistics, padded weight rows/cols are zero, padded token rows sliced).
    x2d = jnp.pad(x.reshape(M, dim).astype(jnp.bfloat16),
                  ((0, M_pad - M), (0, dim_pad - dim)))
    g2 = jnp.pad(gamma.astype(jnp.float32), (0, dim_pad - dim)).reshape(1, dim_pad)
    be2 = jnp.pad(beta.astype(jnp.float32), (0, dim_pad - dim)).reshape(1, dim_pad)
    w1p = jnp.pad(w1, ((0, dim_pad - dim), (0, hid_pad - hidden))).astype(jnp.bfloat16)
    b1p = jnp.pad(b1.astype(jnp.float32), (0, hid_pad - hidden)).reshape(1, hid_pad)
    w2p = jnp.pad(w2, ((0, hid_pad - hidden), (0, out_pad - out_dim))).astype(jnp.bfloat16)
    b2p = jnp.pad(b2.astype(jnp.float32), (0, out_pad - out_dim)).reshape(1, out_pad)

    # ---- kernels ------------------------------------------------------------
    def kernel_resident(x_ref, g_ref, be_ref, w1_ref, b1_ref, w2_ref, b2_ref, o_ref):
        xln = _layer_norm_f32(x_ref[...].astype(jnp.float32),
                              g_ref[...], be_ref[...], dim, need_mask)
        h = jnp.dot(xln.astype(jnp.bfloat16), w1_ref[...],
                    preferred_element_type=jnp.float32)
        h = jax.nn.gelu(h + b1_ref[...], approximate=True)   # tanh GELU -> EUP
        out = jnp.dot(h.astype(jnp.bfloat16), w2_ref[...],
                      preferred_element_type=jnp.float32)
        o_ref[...] = (out + b2_ref[...]).astype(o_ref.dtype)

    def kernel_streaming(x_ref, g_ref, be_ref, w1_ref, b1_ref, w2_ref, b2_ref,
                         o_ref, xln_ref, acc_ref):
        k = pl.program_id(1)

        # LayerNorm once per token tile; keep bf16 activations for the MXU.
        @pl.when(k == 0)
        def _():
            xln = _layer_norm_f32(x_ref[...].astype(jnp.float32),
                                  g_ref[...], be_ref[...], dim, need_mask)
            xln_ref[...] = xln.astype(jnp.bfloat16)
            acc_ref[...] = jnp.zeros_like(acc_ref)

        h = jnp.dot(xln_ref[...], w1_ref[...], preferred_element_type=jnp.float32)
        h = jax.nn.gelu(h + b1_ref[...], approximate=True)    # tanh GELU -> EUP
        acc_ref[...] += jnp.dot(h.astype(jnp.bfloat16), w2_ref[...],
                                preferred_element_type=jnp.float32)

        @pl.when(k == pl.num_programs(1) - 1)
        def _():
            o_ref[...] = (acc_ref[...] + b2_ref[...]).astype(o_ref.dtype)

    if resident:
        grid_spec = pltpu.PrefetchScalarGridSpec(
            num_scalar_prefetch=0,
            grid=(n_tok,),
            in_specs=[
                pl.BlockSpec((tm_eff, dim_pad), lambda i: (i, 0)),     # x tile
                pl.BlockSpec((1, dim_pad), lambda i: (0, 0)),          # gamma
                pl.BlockSpec((1, dim_pad), lambda i: (0, 0)),          # beta
                pl.BlockSpec((dim_pad, hid_pad), lambda i: (0, 0)),    # W1 (resident)
                pl.BlockSpec((1, hid_pad), lambda i: (0, 0)),          # b1
                pl.BlockSpec((hid_pad, out_pad), lambda i: (0, 0)),    # W2 (resident)
                pl.BlockSpec((1, out_pad), lambda i: (0, 0)),          # b2
            ],
            out_specs=pl.BlockSpec((tm_eff, out_pad), lambda i: (i, 0)),
        )
        kernel = kernel_resident
        dim_sem = ("parallel",)
    else:
        grid_spec = pltpu.PrefetchScalarGridSpec(
            num_scalar_prefetch=0,
            grid=(n_tok, n_hid),
            in_specs=[
                pl.BlockSpec((tm_eff, dim_pad), lambda i, k: (i, 0)),  # x tile
                pl.BlockSpec((1, dim_pad), lambda i, k: (0, 0)),       # gamma
                pl.BlockSpec((1, dim_pad), lambda i, k: (0, 0)),       # beta
                pl.BlockSpec((dim_pad, th_eff), lambda i, k: (0, k)),  # W1 chunk
                pl.BlockSpec((1, th_eff), lambda i, k: (0, k)),        # b1 chunk
                pl.BlockSpec((th_eff, out_pad), lambda i, k: (k, 0)),  # W2 chunk
                pl.BlockSpec((1, out_pad), lambda i, k: (0, 0)),       # b2
            ],
            out_specs=pl.BlockSpec((tm_eff, out_pad), lambda i, k: (i, 0)),
            scratch_shapes=[
                pltpu.VMEM((tm_eff, dim_pad), jnp.bfloat16),   # LayerNorm'd acts
                pltpu.VMEM((tm_eff, out_pad), jnp.float32),    # output accumulator
            ],
        )
        kernel = kernel_streaming
        dim_sem = ("parallel", "arbitrary")

    vmem_limit = min(max(int(footprint * 1.25) + (4 << 20), 16 << 20), vmem_cap)

    cost = pl.CostEstimate(
        flops=2 * M * dim * hidden + 2 * M * hidden * out_dim,
        transcendentals=M * hidden,   # one tanh per hidden activation
        bytes_accessed=(M_pad * dim_pad * 2                       # x (bf16)
                        + (1 if resident else n_tok) * w_bytes    # weights
                        + M_pad * out_pad * out_isz),             # output
    )

    out2d = pl.pallas_call(
        kernel,
        out_shape=jax.ShapeDtypeStruct((M_pad, out_pad), out_dtype),
        grid_spec=grid_spec,
        compiler_params=pltpu.CompilerParams(
            dimension_semantics=dim_sem,
            vmem_limit_bytes=vmem_limit,
        ),
        cost_estimate=cost,
    )(x2d, g2, be2, w1p, b1p, w2p, b2p)

    return out2d[:M, :out_dim].reshape(B, S, out_dim)


# ---------------------------- references -------------------------------------
def _reference_exact_f32(x, gamma, beta, w1, b1, w2, b2):
    xf = x.astype(jnp.float32)
    mean = jnp.mean(xf, axis=-1, keepdims=True)
    var = jnp.mean((xf - mean) ** 2, axis=-1, keepdims=True)
    xln = (xf - mean) * jax.lax.rsqrt(var + _LN_EPS) * gamma + beta
    h = xln @ w1 + b1
    h = jax.nn.gelu(h, approximate=False)
    return (h @ w2 + b2).astype(x.dtype)


def _reference_kernel_faithful(x, gamma, beta, w1, b1, w2, b2):
    # Mirrors the kernel's dataflow: bf16 input, f32 LayerNorm, bf16 MXU
    # operands with f32 accumulation, tanh-approximate GELU.
    xf = x.astype(jnp.bfloat16).astype(jnp.float32)
    mean = jnp.mean(xf, axis=-1, keepdims=True)
    var = jnp.mean((xf - mean) ** 2, axis=-1, keepdims=True)
    xln = (xf - mean) * jax.lax.rsqrt(var + _LN_EPS) * gamma + beta
    h = jnp.einsum("bsd,dh->bsh", xln.astype(jnp.bfloat16), w1.astype(jnp.bfloat16),
                   preferred_element_type=jnp.float32) + b1
    h = jax.nn.gelu(h, approximate=True)
    o = jnp.einsum("bsh,ho->bso", h.astype(jnp.bfloat16), w2.astype(jnp.bfloat16),
                   preferred_element_type=jnp.float32) + b2
    return o.astype(x.dtype)


if __name__ == "__main__":
    # Small shapes implied by the module: tokens (batch, seq, dim) -> hidden -> out.
    batch, seq, dim, hidden_dim, out_dim = 2, 8, 32, 64, 32

    key = jax.random.PRNGKey(0)
    kx, k1, k2, k3, k4 = jax.random.split(key, 5)

    x = jax.random.normal(kx, (batch, seq, dim), dtype=jnp.float32)

    gamma = jnp.ones((dim,), dtype=jnp.float32)
    beta = jnp.zeros((dim,), dtype=jnp.float32)
    w1 = jax.random.uniform(k1, (dim, hidden_dim), jnp.float32,
                            minval=-1.0 / math.sqrt(dim), maxval=1.0 / math.sqrt(dim))
    b1 = jax.random.uniform(k2, (hidden_dim,), jnp.float32,
                            minval=-1.0 / math.sqrt(dim), maxval=1.0 / math.sqrt(dim))
    w2 = jax.random.uniform(k3, (hidden_dim, out_dim), jnp.float32,
                            minval=-1.0 / math.sqrt(hidden_dim), maxval=1.0 / math.sqrt(hidden_dim))
    b2 = jax.random.uniform(k4, (out_dim,), jnp.float32,
                            minval=-1.0 / math.sqrt(hidden_dim), maxval=1.0 / math.sqrt(hidden_dim))

    out = feed_forward(x, gamma, beta, w1, b1, w2, b2)
    out = jax.block_until_ready(out)

    ref_tight = _reference_kernel_faithful(x, gamma, beta, w1, b1, w2, b2)
    ref_exact = _reference_exact_f32(x, gamma, beta, w1, b1, w2, b2)

    assert out.shape == (batch, seq, out_dim)
    assert jnp.allclose(out, ref_tight, atol=2e-3, rtol=2e-3), \
        "mismatch vs kernel-faithful (bf16-MXU, tanh-GELU) reference"
    assert jnp.allclose(out, ref_exact, atol=5e-2, rtol=5e-2), \
        "mismatch vs exact f32 reference"

    print("KERNEL_OK")
</pallas_src>

<mosaic_0001>
module attributes {stable_mosaic.version = 11 : i64} {
  func.func @kernel_resident(%arg0: i32, %arg1: memref<16x128xbf16, #tpu.memory_space<vmem>>, %arg2: memref<1x128xf32, #tpu.memory_space<vmem>>, %arg3: memref<1x128xf32, #tpu.memory_space<vmem>>, %arg4: memref<128x128xbf16, #tpu.memory_space<vmem>>, %arg5: memref<1x128xf32, #tpu.memory_space<vmem>>, %arg6: memref<128x128xbf16, #tpu.memory_space<vmem>>, %arg7: memref<1x128xf32, #tpu.memory_space<vmem>>, %arg8: memref<16x128xf32, #tpu.memory_space<vmem>>) attributes {dimension_semantics = [#tpu.dimension_semantics<parallel>], iteration_bounds = array<i64: 1>, scalar_prefetch = 0 : i64, scratch_operands = 0 : i64, tpu.core_type = #tpu.core_type<tc>, window_params = [{transform_indices = @transform_0, window_bounds = array<i64: 16, 128>}, {pipeline_mode = #tpu.pipeline_mode<synchronous>, transform_indices = @transform_1, window_bounds = array<i64: 1, 128>}, {pipeline_mode = #tpu.pipeline_mode<synchronous>, transform_indices = @transform_2, window_bounds = array<i64: 1, 128>}, {pipeline_mode = #tpu.pipeline_mode<synchronous>, transform_indices = @transform_3, window_bounds = array<i64: 128, 128>}, {pipeline_mode = #tpu.pipeline_mode<synchronous>, transform_indices = @transform_4, window_bounds = array<i64: 1, 128>}, {pipeline_mode = #tpu.pipeline_mode<synchronous>, transform_indices = @transform_5, window_bounds = array<i64: 128, 128>}, {pipeline_mode = #tpu.pipeline_mode<synchronous>, transform_indices = @transform_6, window_bounds = array<i64: 1, 128>}, {transform_indices = @transform_7, window_bounds = array<i64: 16, 128>}]} {
    %c0 = arith.constant 0 : index
    %c0_0 = arith.constant 0 : index
    %0 = vector.load %arg1[%c0, %c0_0] : memref<16x128xbf16, #tpu.memory_space<vmem>>, vector<16x128xbf16>
    %1 = arith.extf %0 : vector<16x128xbf16> to vector<16x128xf32>
    %c0_1 = arith.constant 0 : index
    %c0_2 = arith.constant 0 : index
    %2 = vector.load %arg2[%c0_1, %c0_2] : memref<1x128xf32, #tpu.memory_space<vmem>>, vector<1x128xf32>
    %c0_3 = arith.constant 0 : index
    %c0_4 = arith.constant 0 : index
    %3 = vector.load %arg3[%c0_3, %c0_4] : memref<1x128xf32, #tpu.memory_space<vmem>>, vector<1x128xf32>
    %cst = arith.constant dense<0.000000e+00> : vector<16xf32>
    %4 = vector.multi_reduction <add>, %1, %cst [1] : vector<16x128xf32> to vector<16xf32>
    %5 = vector.shape_cast %4 : vector<16xf32> to vector<16x1xf32>
    %cst_5 = arith.constant 3.125000e-02 : f32
    %6 = vector.broadcast %cst_5 : f32 to vector<16x1xf32>
    %7 = arith.mulf %5, %6 : vector<16x1xf32>
    %8 = vector.broadcast %7 : vector<16x1xf32> to vector<16x128xf32>
    %9 = arith.subf %1, %8 : vector<16x128xf32>
    %10 = tpu.iota {dimensions = array<i32: 1>} : vector<16x128xi32>
    %c32_i32 = arith.constant 32 : i32
    %11 = vector.broadcast %c32_i32 : i32 to vector<16x128xi32>
    %12 = arith.cmpi slt, %10, %11 : vector<16x128xi32>
    %cst_6 = arith.constant 0.000000e+00 : f32
    %13 = vector.broadcast %cst_6 : f32 to vector<16x128xf32>
    %14 = arith.select %12, %9, %13 : vector<16x128xi1>, vector<16x128xf32>
    %15 = arith.mulf %14, %14 : vector<16x128xf32>
    %cst_7 = arith.constant dense<0.000000e+00> : vector<16xf32>
    %16 = vector.multi_reduction <add>, %15, %cst_7 [1] : vector<16x128xf32> to vector<16xf32>
    %17 = vector.shape_cast %16 : vector<16xf32> to vector<16x1xf32>
    %cst_8 = arith.constant 3.125000e-02 : f32
    %18 = vector.broadcast %cst_8 : f32 to vector<16x1xf32>
    %19 = arith.mulf %17, %18 : vector<16x1xf32>
    %cst_9 = arith.constant 9.99999974E-6 : f32
    %20 = vector.broadcast %cst_9 : f32 to vector<16x1xf32>
    %21 = arith.addf %19, %20 : vector<16x1xf32>
    %22 = math.rsqrt %21 : vector<16x1xf32>
    %23 = vector.broadcast %22 : vector<16x1xf32> to vector<16x128xf32>
    %24 = arith.mulf %14, %23 : vector<16x128xf32>
    %25 = vector.broadcast %2 : vector<1x128xf32> to vector<16x128xf32>
    %26 = arith.mulf %24, %25 : vector<16x128xf32>
    %27 = vector.broadcast %3 : vector<1x128xf32> to vector<16x128xf32>
    %28 = arith.addf %26, %27 : vector<16x128xf32>
    %29 = arith.truncf %28 : vector<16x128xf32> to vector<16x128xbf16>
    %c0_10 = arith.constant 0 : index
    %c0_11 = arith.constant 0 : index
    %30 = vector.load %arg4[%c0_10, %c0_11] : memref<128x128xbf16, #tpu.memory_space<vmem>>, vector<128x128xbf16>
    %cst_12 = arith.constant dense<0.000000e+00> : vector<16x128xf32>
    %31 = tpu.matmul %29, %30, %cst_12 {dimension_numbers = #tpu.dot_dimension_numbers<[1], [0], [0], [1], [0, 0, 1, 1], [], []>} : vector<16x128xbf16>, vector<128x128xbf16>, vector<16x128xf32> -> vector<16x128xf32>
    %c0_13 = arith.constant 0 : index
    %c0_14 = arith.constant 0 : index
    %32 = vector.load %arg5[%c0_13, %c0_14] : memref<1x128xf32, #tpu.memory_space<vmem>>, vector<1x128xf32>
    %33 = vector.broadcast %32 : vector<1x128xf32> to vector<16x128xf32>
    %34 = arith.addf %31, %33 : vector<16x128xf32>
    %35 = arith.mulf %34, %34 : vector<16x128xf32>
    %36 = arith.mulf %34, %35 : vector<16x128xf32>
    %cst_15 = arith.constant 4.471500e-02 : f32
    %37 = vector.broadcast %cst_15 : f32 to vector<16x128xf32>
    %38 = arith.mulf %37, %36 : vector<16x128xf32>
    %39 = arith.addf %34, %38 : vector<16x128xf32>
    %cst_16 = arith.constant 0.797884583 : f32
    %40 = vector.broadcast %cst_16 : f32 to vector<16x128xf32>
    %41 = arith.mulf %40, %39 : vector<16x128xf32>
    %42 = math.tanh %41 : vector<16x128xf32>
    %cst_17 = arith.constant 1.000000e+00 : f32
    %43 = vector.broadcast %cst_17 : f32 to vector<16x128xf32>
    %44 = arith.addf %43, %42 : vector<16x128xf32>
    %cst_18 = arith.constant 5.000000e-01 : f32
    %45 = vector.broadcast %cst_18 : f32 to vector<16x128xf32>
    %46 = arith.mulf %45, %44 : vector<16x128xf32>
    %47 = arith.mulf %34, %46 : vector<16x128xf32>
    %48 = arith.truncf %47 : vector<16x128xf32> to vector<16x128xbf16>
    %c0_19 = arith.constant 0 : index
    %c0_20 = arith.constant 0 : index
    %49 = vector.load %arg6[%c0_19, %c0_20] : memref<128x128xbf16, #tpu.memory_space<vmem>>, vector<128x128xbf16>
    %cst_21 = arith.constant dense<0.000000e+00> : vector<16x128xf32>
    %50 = tpu.matmul %48, %49, %cst_21 {dimension_numbers = #tpu.dot_dimension_numbers<[1], [0], [0], [1], [0, 0, 1, 1], [], []>} : vector<16x128xbf16>, vector<128x128xbf16>, vector<16x128xf32> -> vector<16x128xf32>
    %c0_22 = arith.constant 0 : index
    %c0_23 = arith.constant 0 : index
    %51 = vector.load %arg7[%c0_22, %c0_23] : memref<1x128xf32, #tpu.memory_space<vmem>>, vector<1x128xf32>
    %52 = vector.broadcast %51 : vector<1x128xf32> to vector<16x128xf32>
    %53 = arith.addf %50, %52 : vector<16x128xf32>
    %c0_24 = arith.constant 0 : index
    %c0_25 = arith.constant 0 : index
    %54 = vector.load %arg8[%c0_24, %c0_25] : memref<16x128xf32, #tpu.memory_space<vmem>>, vector<16x128xf32>
    tpu.vector_store %arg8[%c0_24, %c0_25], %53 {strides = array<i32>} : memref<16x128xf32, #tpu.memory_space<vmem>>, vector<16x128xf32>,
    return
  }
  func.func @transform_0(%arg0: i32) -> (i32, i32) {
    %c0_i32 = arith.constant 0 : i32
    %c0_i32_0 = arith.constant 0 : i32
    return %arg0, %c0_i32 : i32, i32
  }
  func.func @transform_1(%arg0: i32) -> (i32, i32) {
    %c0_i32 = arith.constant 0 : i32
    %c0_i32_0 = arith.constant 0 : i32
    %c0_i32_1 = arith.constant 0 : i32
    return %c0_i32, %c0_i32_0 : i32, i32
  }
  func.func @transform_2(%arg0: i32) -> (i32, i32) {
    %c0_i32 = arith.constant 0 : i32
    %c0_i32_0 = arith.constant 0 : i32
    %c0_i32_1 = arith.constant 0 : i32
    return %c0_i32, %c0_i32_0 : i32, i32
  }
  func.func @transform_3(%arg0: i32) -> (i32, i32) {
    %c0_i32 = arith.constant 0 : i32
    %c0_i32_0 = arith.constant 0 : i32
    %c0_i32_1 = arith.constant 0 : i32
    return %c0_i32, %c0_i32_0 : i32, i32
  }
  func.func @transform_4(%arg0: i32) -> (i32, i32) {
    %c0_i32 = arith.constant 0 : i32
    %c0_i32_0 = arith.constant 0 : i32
    %c0_i32_1 = arith.constant 0 : i32
    return %c0_i32, %c0_i32_0 : i32, i32
  }
  func.func @transform_5(%arg0: i32) -> (i32, i32) {
    %c0_i32 = arith.constant 0 : i32
    %c0_i32_0 = arith.constant 0 : i32
    %c0_i32_1 = arith.constant 0 : i32
    return %c0_i32, %c0_i32_0 : i32, i32
  }
  func.func @transform_6(%arg0: i32) -> (i32, i32) {
    %c0_i32 = arith.constant 0 : i32
    %c0_i32_0 = arith.constant 0 : i32
    %c0_i32_1 = arith.constant 0 : i32
    return %c0_i32, %c0_i32_0 : i32, i32
  }
  func.func @transform_7(%arg0: i32) -> (i32, i32) {
    %c0_i32 = arith.constant 0 : i32
    %c0_i32_0 = arith.constant 0 : i32
    return %arg0, %c0_i32 : i32, i32
  }
}

</mosaic_0001>

<bundles_post_ra>
// kernel: tpu_custom_call.1
= control target key start
LH: loop header
LB: loop body
LE: loop exit
PB: predicated region body
PF: predicated region fallthrough
CT: control target
= control target key end

     0   :  { %12 = vsyncpa [#allocation3], 0  ;;  %s736_s0 = inlined_call_operand.hbm [shape: bf16[16,128], index: 0, kind: input, shape index: {}]   ;;  %s737_s1 = inlined_call_operand.vmem [shape: f32[1,128], index: 1, kind: input, shape index: {}]   ;;  %s738_s2 = inlined_call_operand.vmem [shape: f32[1,128], index: 2, kind: input, shape index: {}]   ;;  %s739_s3 = inlined_call_operand.hbm [shape: bf16[128,128], index: 3, kind: input, shape index: {}]   ;;  %s740_s4 = inlined_call_operand.vmem [shape: f32[1,128], index: 4, kind: input, shape index: {}]   ;;  %s741_s5 = inlined_call_operand.hbm [shape: bf16[128,128], index: 5, kind: input, shape index: {}]   ;;  %s742_s6 = inlined_call_operand.vmem [shape: f32[1,128], index: 6, kind: input, shape index: {}]   ;;  %s743_s7 = inlined_call_operand.hbm [shape: f32[16,128], index: 7, kind: output, shape index: {}]  }
   0x1   :  { %13 = vsyncpa [#allocation6], 0 }
   0x2   :  { %14 = vsyncpa [#allocation4], 0  ;;  %s592_s24 = smov [#allocation5]   ;;  %s593_s26 = smov [#allocation2]  }
   0x3   :  { %s36_s25 = sshll.u32 %s592_s24, 4  ;;  %s20_s27 = sshll.u32 %s593_s26, 4  ;;  %s37_s25 = int_to_ptr.vmem [resolvable:$true] %s36_s25  ;;  %s642_s27 = int_to_ptr.vmem [resolvable:$true] %s20_s27 }
   0x4   :  { %s498_s30 = scalar_lea.hbm %s739_s3, 1024 }
   0x5   :  { %p499_p0 = scmp.ne.s32.totalorder %s739_s3, %s498_s30  ;;  %p502_p1 = scmp.lt.u32.totalorder %s498_s30, %s739_s3 }
   0x7   :  { %p504_p2 = pnand %p502_p1, %p499_p0 }
   0x9   :  { %507 = shalt.err (!%p504_p2)
}
   0xa   :  { %s508_s12 = scalar_lea.vmem %s37_s25, 1024  ;;  %p513_p4 = scmp.lt.s32.totalorder %s37_s25, %s37_s25 }
   0xb   :  { %p509_p3 = scmp.ne.s32.totalorder %s37_s25, %s508_s12  ;;  %p514_p5 = scmp.lt.s32.totalorder %s508_s12, %s508_s12 }
   0xd   :  { %p515_p6 = por %p514_p5, %p513_p4 }
   0xf   :  { %p516_p7 = pnand %p515_p6, %p509_p3 }
  0x11   :  { %519 = shalt.err (!%p516_p7)
}
  0x12   :  { %s594_s13 = smov 64   ;;  %s595_s14 = smov 4  }
  0x13   :  { %42 = dma.hbm_to_vmem [thread:$0]  %s739_s3, 1024, %s37_s25, [#allocation6], %s594_s13, %s594_s13, %s595_s14  }
  0x14   :  { %s520_s19 = scalar_lea.hbm %s736_s0, 128 }
  0x15   :  { %p521_p8 = scmp.ne.s32.totalorder %s736_s0, %s520_s19  ;;  %p524_p9 = scmp.lt.u32.totalorder %s520_s19, %s736_s0 }
  0x17   :  { %p526_p10 = pnand %p524_p9, %p521_p8 }
  0x19   :  { %529 = shalt.err (!%p526_p10)
}
  0x1a   :  { %s530_s24 = scalar_lea.vmem %s642_s27, 128  ;;  %p535_p12 = scmp.lt.s32.totalorder %s642_s27, %s642_s27 }
  0x1b   :  { %p531_p11 = scmp.ne.s32.totalorder %s642_s27, %s530_s24  ;;  %p536_p13 = scmp.lt.s32.totalorder %s530_s24, %s530_s24 }
  0x1d   :  { %p537_p0 = por %p536_p13, %p535_p12 }
  0x1f   :  { %p538_p1 = pnand %p537_p0, %p531_p11 }
  0x21   :  { %541 = shalt.err (!%p538_p1)
}
  0x22   :  { %26 = dma.hbm_to_vmem [thread:$0]  %s736_s0, 128, %s642_s27, [#allocation3], %s594_s13, %s594_s13, %s595_s14  }
  0x23   :  { %s596_s26 = smov [#allocation7]   ;;  %s542_s8 = scalar_lea.hbm %s741_s5, 1024 }
  0x24   :  { %s50_s28 = sshll.u32 %s596_s26, 4  ;;  %p543_p2 = scmp.ne.s32.totalorder %s741_s5, %s542_s8  ;;  %s51_s28 = int_to_ptr.vmem [resolvable:$true] %s50_s28 }
  0x25   :  { %p546_p3 = scmp.lt.u32.totalorder %s542_s8, %s741_s5 }
  0x27   :  { %p548_p4 = pnand %p546_p3, %p543_p2 }
  0x29   :  { %551 = shalt.err (!%p548_p4)
}
  0x2a   :  { %s552_s15 = scalar_lea.vmem %s51_s28, 1024  ;;  %p557_p6 = scmp.lt.s32.totalorder %s51_s28, %s51_s28 }
  0x2b   :  { %p553_p5 = scmp.ne.s32.totalorder %s51_s28, %s552_s15  ;;  %p558_p7 = scmp.lt.s32.totalorder %s552_s15, %s552_s15 }
  0x2d   :  { %p559_p8 = por %p558_p7, %p557_p6 }
  0x2f   :  { %p560_p9 = pnand %p559_p8, %p553_p5 }
  0x31   :  { %563 = shalt.err (!%p560_p9)
}
  0x32   :  { %56 = dma.hbm_to_vmem [thread:$0]  %s741_s5, 1024, %s51_s28, [#allocation6], %s594_s13, %s594_s13, %s595_s14  }
  0x33   :  { %586 = dma.done.wait [#allocation3], 128  }
  0x34   :  { %587 = vsyncadd [#allocation3], 4294967168 }
  0x35   :  { %588 = dma.done.wait [#allocation6], 2048  }
  0x36   :  { %589 = vsyncadd [#allocation6], 4294965248  ;;  %v403_v0 = vld [vmem:[#allocation2] sm:$0xff]   ;;  %v474_v3 = vld [vmem:[#allocation5] sm:$0xff]   ;;  %v597_v4 = vmov 0.0   ;;  %v83_v5 = vlaneseq  ;;  %vm598_vm1 = vmmov 0  }
  0x37   :  { %v404_v1 = vunpack.c.l.bf16 %v403_v0  ;;  %v405_v2 = vunpack.c.h.bf16 %v403_v0  ;;  %424 = vmatprep.subr.bf16.mxu0 %v597_v4  ;;  %444 = vmatprep.subr.bf16.mxu1 %v597_v4  ;;  %v475_v17 = vld [vmem:[#allocation5 + $0x8] sm:$0xff]   ;;  %v476_v18 = vld [vmem:[#allocation5 + $0x10] sm:$0xff]   ;;  %v477_v19 = vld [vmem:[#allocation5 + $0x18] sm:$0xff]   ;;  %s599_s18 = smov [#allocation8]  }
  0x38   :  { %425 = vmatpush3.bf16.msra.mxu0 %v474_v3  ;;  %v84_v6 = vand.u32 127, %v83_v5  ;;  %v478_v20 = vld [vmem:[#allocation5 + $0x20] sm:$0xff]   ;;  %440 = vmatprep.mubr.msk.bf16.mxu0 %vm598_vm1, %v597_v4  ;;  %v479_v21 = vld [vmem:[#allocation5 + $0x28] sm:$0xff]   ;;  %v480_v22 = vld [vmem:[#allocation5 + $0x30] sm:$0xff]   ;;  %s369_s19 = sshll.u32 %s599_s18, 4  ;;  %s370_s19 = int_to_ptr.vmem [resolvable:$true] %s369_s19 }
  0x39   :  { %75 = vadd.xlane.f32.xlu0 %v404_v1  ;;  %426 = vmatprep.subr.bf16.mxu0 %v597_v4  ;;  %v481_v23 = vld [vmem:[#allocation5 + $0x38] sm:$0xff]   ;;  %v482_v41 = vld [vmem:[#allocation7] sm:$0xff]   ;;  %v483_v42 = vld [vmem:[#allocation7 + $0x8] sm:$0xff]   ;;  %s564_s20 = scalar_lea.vmem %s370_s19, 256  ;;  %p569_p11 = scmp.lt.s32.totalorder %s370_s19, %s370_s19 }
  0x3a   :  { %vm85_vm0 = vcmp.lt.s32.totalorder %v84_v6, 32  ;;  %460 = vmatprep.mubr.msk.bf16.mxu1 %vm598_vm1, %v597_v4  ;;  %v382_v32 = vld [vmem:[%s737_s1] ss:$0 sm:$0xff]  ;;  %445 = vmatpush3.bf16.msra.mxu1 %v482_v41  ;;  %v484_v43 = vld [vmem:[#allocation7 + $0x10] sm:$0xff]   ;;  %v486_v45 = vld [vmem:[#allocation7 + $0x20] sm:$0xff]   ;;  %p565_p10 = scmp.ne.s32.totalorder %s370_s19, %s564_s20  ;;  %p570_p12 = scmp.lt.s32.totalorder %s564_s20, %s564_s20 }
  0x3b   :  { %v383_v36 = vld [vmem:[%s738_s2] ss:$0 sm:$0xff]  ;;  %446 = vmatprep.subr.bf16.mxu1 %v597_v4  ;;  %v487_v46 = vld [vmem:[#allocation7 + $0x28] sm:$0xff]   ;;  %v488_v47 = vld [vmem:[#allocation7 + $0x30] sm:$0xff]  }
  0x3c   :  { %427 = vmatpush3.bf16.msra.mxu0 %v475_v17  ;;  %v485_v44 = vld [vmem:[#allocation7 + $0x18] sm:$0xff]   ;;  %p571_p13 = por %p570_p12, %p569_p11 }
  0x3d   :  { %77 = vadd.xlane.f32.xlu0 %v405_v2  ;;  %428 = vmatprep.subr.bf16.mxu0 %v597_v4  ;;  %v489_v48 = vld [vmem:[#allocation7 + $0x38] sm:$0xff]  }
  0x3e   :  { %447 = vmatpush3.bf16.msra.mxu1 %v483_v42  ;;  %v384_v49 = vld [vmem:[%s740_s4] ss:$0 sm:$0xff]  ;;  %p572_p0 = pnand %p571_p13, %p565_p10 }
  0x3f   :  { %448 = vmatprep.subr.bf16.mxu1 %v597_v4 }
  0x40   :  { %429 = vmatpush3.bf16.msra.mxu0 %v476_v18 }
  0x41   :  { %430 = vmatprep.subr.bf16.mxu0 %v597_v4 }
  0x42   :  { %449 = vmatpush3.bf16.msra.mxu1 %v484_v43 }
  0x43   :  { %450 = vmatprep.subr.bf16.mxu1 %v597_v4 }
  0x44   :  { %431 = vmatpush3.bf16.msra.mxu0 %v477_v19 }
  0x45   :  { %432 = vmatprep.subr.bf16.mxu0 %v597_v4 }
  0x46   :  { %451 = vmatpush3.bf16.msra.mxu1 %v485_v44 }
  0x47   :  { %452 = vmatprep.subr.bf16.mxu1 %v597_v4 }
  0x48   :  { %433 = vmatpush3.bf16.msra.mxu0 %v478_v20 }
  0x49   :  { %434 = vmatprep.subr.bf16.mxu0 %v597_v4 }
  0x4a   :  { %453 = vmatpush3.bf16.msra.mxu1 %v486_v45 }
  0x4b   :  { %454 = vmatprep.subr.bf16.mxu1 %v597_v4 }
  0x4c   :  { %435 = vmatpush3.bf16.msra.mxu0 %v479_v21 }
  0x4d   :  { %436 = vmatprep.subr.bf16.mxu0 %v597_v4 }
  0x4e   :  { %455 = vmatpush3.bf16.msra.mxu1 %v487_v46 }
  0x4f   :  { %456 = vmatprep.subr.bf16.mxu1 %v597_v4 }
  0x50   :  { %437 = vmatpush3.bf16.msra.mxu0 %v480_v22 }
  0x51   :  { %438 = vmatprep.subr.bf16.mxu0 %v597_v4 }
  0x52   :  { %457 = vmatpush3.bf16.msra.mxu1 %v488_v47 }
  0x53   :  { %458 = vmatprep.subr.bf16.mxu1 %v597_v4 }
  0x54   :  { %439 = vmatpush3.bf16.msra.mxu0 %v481_v23 }
  0x56   :  { %459 = vmatpush3.bf16.msra.mxu1 %v489_v48 }
  0xc6   :  { %v76_v7 = vpop.xlane.xlu0 %75 }
  0xc7   :  { %v79_v8 = vmul.f32 0.03125, %v76_v7 }
  0xc9   :  { %v81_v9 = vsub.f32 %v404_v1, %v79_v8 }
  0xca   :  { %v78_v10 = vpop.xlane.xlu0 %77 }
  0xcb   :  { %v80_v11 = vmul.f32 0.03125, %v78_v10  ;;  %v86_v12 = vsel %vm85_vm0, %v81_v9, 0.0 }
  0xcc   :  { %v88_v13 = vmul.f32 %v86_v12, %v86_v12 }
  0xcd   :  { %v82_v14 = vsub.f32 %v405_v2, %v80_v11  ;;  %v393_v11 = vld [vmem:[%s742_s6] ss:$0 sm:$0xff] }
  0xce   :  { %90 = vadd.xlane.f32.xlu1 %v88_v13 }
  0xcf   :  { %v87_v15 = vsel %vm85_vm0, %v82_v14, 0.0 }
  0xd0   :  { %v89_v16 = vmul.f32 %v87_v15, %v87_v15 }
  0xd2   :  { %92 = vadd.xlane.f32.xlu1 %v89_v16 }
 0x15b   :  { %v91_v24 = vpop.xlane.xlu1 %90 }
 0x15c   :  { %v94_v25 = vmul.f32 0.03125, %v91_v24 }
 0x15e   :  { %v96_v26 = vadd.f32 1e-05, %v94_v25 }
 0x15f   :  { %v93_v27 = vpop.xlane.xlu1 %92 }
 0x160   :  { %490 = vrsqrt.f32 %v96_v26  ;;  %v95_v28 = vmul.f32 0.03125, %v93_v27 }
 0x162   :  { %v97_v29 = vadd.f32 1e-05, %v95_v28 }
 0x164   :  { %492 = vrsqrt.f32 %v97_v29 }
 0x16a   :  { %v491_v30 = vpop.eup %490 }
 0x16b   :  { %v100_v31 = vmul.f32 %v491_v30, %v86_v12 }
 0x16d   :  { %v108_v35 = vmul.f32 %v382_v32, %v100_v31 }
 0x16e   :  { %v493_v33 = vpop.eup %492 }
 0x16f   :  { %v101_v34 = vmul.f32 %v493_v33, %v87_v15  ;;  %v116_v38 = vadd.f32 %v383_v36, %v108_v35 }
 0x171   :  { %v109_v37 = vmul.f32 %v382_v32, %v101_v34 }
 0x173   :  { %v117_v39 = vadd.f32 %v383_v36, %v109_v37 }
 0x175   :  { %v118_v40 = vpack.c.bf16 %v117_v39, %v116_v38 }
 0x177   :  { %441 = vmatmul.mubr.bf16.vlgmr.msra.gmra.mrb[0].mxu0 %v118_v40 }
 0x24a   :  { %v224_v50 = vpop.f32.mrb[0].mxu0 }
 0x24b   :  { %v225_v51 = vadd.f32 %v384_v49, %v224_v50  ;;  %v442_v52 = vpop.f32.mrb[1].mxu0 }
 0x24c   :  { %v227_v53 = vpop.f32.mrb[2].mxu0 }
 0x24d   :  { %v231_v54 = vmul.f32 %v225_v51, %v225_v51  ;;  %v228_v55 = vadd.f32 %v384_v49, %v227_v53  ;;  %v443_v56 = vpop.f32.mrb[3].mxu0 }
 0x24f   :  { %v233_v57 = vmul.f32 %v231_v54, %v225_v51  ;;  %v232_v58 = vmul.f32 %v228_v55, %v228_v55 }
 0x251   :  { %v235_v59 = vmul.f32 0.044715, %v233_v57  ;;  %v234_v60 = vmul.f32 %v232_v58, %v228_v55 }
 0x253   :  { %v237_v61 = vadd.f32 %v235_v59, %v225_v51  ;;  %v236_v62 = vmul.f32 0.044715, %v234_v60 }
 0x255   :  { %v239_v63 = vmul.f32 0.7978846, %v237_v61  ;;  %v238_v0 = vadd.f32 %v236_v62, %v228_v55 }
 0x257   :  { %494 = vtanh.f32 %v239_v63  ;;  %v240_v1 = vmul.f32 0.7978846, %v238_v0 }
 0x259   :  { %496 = vtanh.f32 %v240_v1 }
 0x261   :  { %v495_v2 = vpop.eup %494 }
 0x262   :  { %v243_v3 = vadd.f32 1.0, %v495_v2 }
 0x263   :  { %v497_v4 = vpop.eup %496 }
 0x264   :  { %v244_v5 = vadd.f32 1.0, %v497_v4  ;;  %v245_v6 = vmul.f32 0.5, %v243_v3 }
 0x266   :  { %v246_v7 = vmul.f32 0.5, %v244_v5  ;;  %v247_v8 = vmul.f32 %v245_v6, %v225_v51 }
 0x268   :  { %v248_v9 = vmul.f32 %v246_v7, %v228_v55 }
 0x26a   :  { %v249_v10 = vpack.c.bf16 %v248_v9, %v247_v8 }
 0x26c   :  { %461 = vmatmul.mubr.bf16.vlgmr.msra.gmra.mrb[0].mxu1 %v249_v10 }
 0x33f   :  { %v355_v12 = vpop.f32.mrb[0].mxu1 }
 0x340   :  { %v356_v13 = vadd.f32 %v393_v11, %v355_v12  ;;  %v462_v14 = vpop.f32.mrb[1].mxu1 }
 0x341   :  { %v358_v15 = vpop.f32.mrb[2].mxu1 }
 0x342   :  { %362 = vst [vmem:[#allocation8] sm:$0xff] %v356_v13  ;;  %v359_v16 = vadd.f32 %v393_v11, %v358_v15  ;;  %v463_v17 = vpop.f32.mrb[3].mxu1 }
 0x344   :  { %363 = vst [vmem:[#allocation8 + $0x8] sm:$0xff] %v359_v16 }
 0x345   :  { %575 = shalt.err (!%p572_p0)
}
 0x346   :  { %s576_s22 = scalar_lea.hbm %s743_s7, 256 }
 0x347   :  { %p577_p1 = scmp.ne.s32.totalorder %s743_s7, %s576_s22  ;;  %p580_p2 = scmp.lt.u32.totalorder %s576_s22, %s743_s7 }
 0x349   :  { %p582_p3 = pnand %p580_p2, %p577_p1 }
 0x34b   :  { %585 = shalt.err (!%p582_p3)
}
 0x34c   :  { %s600_s26 = smov 128   ;;  %s601_s28 = smov 8  }
 0x34d   :  { %375 = dma.vmem_to_hbm [thread:$0]  %s370_s19, 256, %s743_s7, [#allocation4], %s600_s26, %s600_s26, %s601_s28  }
 0x34e   :  { %590 = dma.done.wait [#allocation4], 256  }
 0x34f   :  { %591 = vsyncadd [#allocation4], 4294967040 }
 0x350   :  { %379 = vsyncpa [#allocation3], 1 }
 0x351   :  { %380 = vsyncpa [#allocation6], 1 }
 0x352   :  { %381 = vsyncpa [#allocation4], 1 }

</bundles_post_ra>
